<compile_context>
chip_gen: v7x
topology: tpu7x:2x2x1
jax: 0.10.0
libtpu: 0.0.40
codegen_flags: <defaults>
</compile_context>

<pallas_src>
import jax
import jax.numpy as jnp
from jax import lax
from jax.experimental import pallas as pl
from jax.experimental.pallas import tpu as pltpu


def _gaussian_tile_kernel(scale_ref, xi_ref, xj_ref, k_ref):
    # scale_ref : (1,) f32 in SMEM, holds  -1 / (2 * sigma_square)
    # xi_ref    : (TM, Dp) row tile of X (native dtype)
    # xj_ref    : (TN, Dp) column tile of X (native dtype)
    # k_ref     : (TM, TN) f32 output tile
    xi = xi_ref[...]
    xj = xj_ref[...]

    # Cross-tile gram on the MXU, contracting the feature dim of both
    # operands directly -> no XLU transpose of xj, native-dtype operands.
    gram = lax.dot_general(
        xi, xj,
        dimension_numbers=(((1,), (1,)), ((), ())),
        preferred_element_type=jnp.float32)                  # (TM, TN)

    xi32 = xi.astype(jnp.float32)
    xj32 = xj.astype(jnp.float32)

    # Row-tile squared norms as a (TM, 1) column (natural lane reduction).
    sq_i = jnp.sum(xi32 * xi32, axis=1, keepdims=True)        # (TM, 1)

    # Column-tile squared norms directly in row-vector (1, TN) layout via a
    # ones-vector matmul -> avoids transposing a (TN, 1) column through XLU.
    ones_row = jnp.ones((1, xj32.shape[1]), dtype=jnp.float32)
    sq_j = lax.dot_general(
        ones_row, xj32 * xj32,
        dimension_numbers=(((1,), (1,)), ((), ())),
        preferred_element_type=jnp.float32)                   # (1, TN)

    d2 = jnp.maximum(sq_i + sq_j - 2.0 * gram, 0.0)           # numerical guard
    # Divide already folded into the precomputed negative reciprocal scale:
    k_ref[...] = jnp.exp(d2 * scale_ref[0]).astype(k_ref.dtype)


def _pick_tile(n_pad, d_pad, itemsize):
    """Largest tile in {512, 256, 128} whose double-buffered working set fits
    comfortably under a 32 MiB scoped VMEM budget (portable incl. v7x)."""
    for t in (512, 256, 128):
        if n_pad % t != 0:
            continue
        vmem = 2 * (2 * t * d_pad * itemsize) + 2 * t * t * 4
        if vmem <= 24 * 1024 * 1024:
            return t
    return 128


def gaussian_kernel(x, *, sigma=None, track_running_stats=True, alpha=1.0):
    """Returns (kernel_matrix [N, N] float32, sigma_square scalar float32)."""
    assert track_running_stats or sigma is not None
    n, d = x.shape

    # sigma_square from O(N*D) sufficient statistics (closed form of
    # mean over all N^2 pairwise squared distances, diagonal included):
    #   mean(d2) = 2/N * sum_i ||x_i||^2 - 2/N^2 * ||sum_i x_i||^2
    if track_running_stats:
        x32 = x.astype(jnp.float32)
        sum_sq = jnp.sum(x32 * x32)
        col_sum = jnp.sum(x32, axis=0)
        mean_d2 = 2.0 * sum_sq / n - 2.0 * jnp.dot(col_sum, col_sum) / (n * n)
        sigma_square = jnp.float32(alpha) * mean_d2
    else:
        sigma_square = jnp.float32(float(sigma) ** 2)

    # Negative reciprocal scale, computed once outside the N^2 hot path.
    scale = jnp.reshape((-0.5 / sigma_square).astype(jnp.float32), (1,))

    # Pad N (lane-dense 128-multiple output tiles) and D (MXU contraction
    # alignment). Zero padding does not change distances between real rows.
    n_pad = pl.cdiv(n, 128) * 128
    d_pad = pl.cdiv(d, 128) * 128
    tile = _pick_tile(n_pad, d_pad, x.dtype.itemsize)

    x_p = jnp.pad(x, ((0, n_pad - n), (0, d_pad - d)))

    grid = (n_pad // tile, n_pad // tile)
    k_pad = pl.pallas_call(
        _gaussian_tile_kernel,
        out_shape=jax.ShapeDtypeStruct((n_pad, n_pad), jnp.float32),
        grid=grid,
        in_specs=[
            pl.BlockSpec(memory_space=pltpu.MemorySpace.SMEM),   # scale (1,)
            pl.BlockSpec((tile, d_pad), lambda i, j: (i, 0)),    # row tile
            pl.BlockSpec((tile, d_pad), lambda i, j: (j, 0)),    # col tile
        ],
        out_specs=pl.BlockSpec((tile, tile), lambda i, j: (i, j)),
        compiler_params=pltpu.CompilerParams(
            dimension_semantics=("parallel", "parallel"),
            vmem_limit_bytes=32 * 1024 * 1024,
        ),
    )(scale, x_p, x_p)

    return k_pad[:n, :n], sigma_square


def _reference(x, *, sigma=None, track_running_stats=True, alpha=1.0):
    x = x.astype(jnp.float32)
    d2 = jnp.sum((x[None, :, :] - x[:, None, :]) ** 2, axis=2)
    if track_running_stats:
        sigma_square = alpha * jnp.mean(d2)
    else:
        sigma_square = jnp.float32(float(sigma) ** 2)
    return jnp.exp(-d2 / (2.0 * sigma_square)), sigma_square


if __name__ == "__main__":
    # Small deterministic input: N=8 samples, D=32 features.
    key = jax.random.PRNGKey(0)
    x = jax.random.normal(key, (8, 32), dtype=jnp.float32)

    # Case 1: track_running_stats=True (sigma estimated from the batch).
    k_mat, sigma_sq = gaussian_kernel(x, track_running_stats=True, alpha=1.0)
    jax.block_until_ready((k_mat, sigma_sq))

    k_ref, sigma_ref = _reference(x, track_running_stats=True, alpha=1.0)
    assert k_mat.shape == (8, 8) and k_mat.dtype == jnp.float32
    assert jnp.allclose(k_mat, k_ref, atol=1e-4, rtol=1e-4)
    assert jnp.allclose(sigma_sq, sigma_ref, atol=1e-3, rtol=1e-4)

    # Case 2: fixed sigma, no running stats.
    k_mat2, sigma_sq2 = gaussian_kernel(
        x, sigma=2.0, track_running_stats=False, alpha=1.0)
    jax.block_until_ready((k_mat2, sigma_sq2))
    k_ref2, _ = _reference(x, sigma=2.0, track_running_stats=False)
    assert jnp.allclose(k_mat2, k_ref2, atol=1e-4, rtol=1e-4)

    # Case 3: bf16 input smoke test (MXU-native path, no upcast before matmul).
    xb = jax.random.normal(jax.random.PRNGKey(1), (8, 32), dtype=jnp.bfloat16)
    k_mat3, sigma_sq3 = gaussian_kernel(xb, track_running_stats=True, alpha=1.0)
    jax.block_until_ready((k_mat3, sigma_sq3))
    assert k_mat3.shape == (8, 8) and k_mat3.dtype == jnp.float32

    print("KERNEL_OK")
</pallas_src>

<mosaic_0001>
module attributes {stable_mosaic.version = 11 : i64} {
  func.func @_gaussian_tile_kernel(%arg0: i32, %arg1: i32, %arg2: memref<1xf32, #tpu.memory_space<smem>>, %arg3: memref<128x128xf32, #tpu.memory_space<vmem>>, %arg4: memref<128x128xf32, #tpu.memory_space<vmem>>, %arg5: memref<128x128xf32, #tpu.memory_space<vmem>>) attributes {dimension_semantics = [#tpu.dimension_semantics<parallel>, #tpu.dimension_semantics<parallel>], iteration_bounds = array<i64: 1, 1>, scalar_prefetch = 0 : i64, scratch_operands = 0 : i64, tpu.core_type = #tpu.core_type<tc>, window_params = [{transform_indices = @transform_0, window_bounds = array<i64: 1>}, {transform_indices = @transform_1, window_bounds = array<i64: 128, 128>}, {transform_indices = @transform_2, window_bounds = array<i64: 128, 128>}, {transform_indices = @transform_3, window_bounds = array<i64: 128, 128>}]} {
    %c0 = arith.constant 0 : index
    %c0_0 = arith.constant 0 : index
    %0 = vector.load %arg3[%c0, %c0_0] : memref<128x128xf32, #tpu.memory_space<vmem>>, vector<128x128xf32>
    %c0_1 = arith.constant 0 : index
    %c0_2 = arith.constant 0 : index
    %1 = vector.load %arg4[%c0_1, %c0_2] : memref<128x128xf32, #tpu.memory_space<vmem>>, vector<128x128xf32>
    %cst = arith.constant dense<0.000000e+00> : vector<128x128xf32>
    %2 = tpu.matmul %0, %1, %cst {dimension_numbers = #tpu.dot_dimension_numbers<[1], [1], [0], [0], [0, 0, 1, 0], [], []>} : vector<128x128xf32>, vector<128x128xf32>, vector<128x128xf32> -> vector<128x128xf32>
    %3 = arith.mulf %0, %0 : vector<128x128xf32>
    %cst_3 = arith.constant dense<0.000000e+00> : vector<128xf32>
    %4 = vector.multi_reduction <add>, %3, %cst_3 [1] : vector<128x128xf32> to vector<128xf32>
    %5 = vector.shape_cast %4 : vector<128xf32> to vector<128x1xf32>
    %cst_4 = arith.constant 1.000000e+00 : f32
    %6 = vector.broadcast %cst_4 : f32 to vector<1x128xf32>
    %7 = arith.mulf %1, %1 : vector<128x128xf32>
    %cst_5 = arith.constant dense<0.000000e+00> : vector<1x128xf32>
    %8 = tpu.matmul %6, %7, %cst_5 {dimension_numbers = #tpu.dot_dimension_numbers<[1], [1], [0], [0], [0, 0, 1, 0], [], []>} : vector<1x128xf32>, vector<128x128xf32>, vector<1x128xf32> -> vector<1x128xf32>
    %9 = vector.broadcast %5 : vector<128x1xf32> to vector<128x128xf32>
    %10 = vector.broadcast %8 : vector<1x128xf32> to vector<128x128xf32>
    %11 = arith.addf %9, %10 : vector<128x128xf32>
    %cst_6 = arith.constant 2.000000e+00 : f32
    %12 = vector.broadcast %cst_6 : f32 to vector<128x128xf32>
    %13 = arith.mulf %12, %2 : vector<128x128xf32>
    %14 = arith.subf %11, %13 : vector<128x128xf32>
    %cst_7 = arith.constant 0.000000e+00 : f32
    %15 = vector.broadcast %cst_7 : f32 to vector<128x128xf32>
    %16 = arith.maximumf %14, %15 : vector<128x128xf32>
    %c0_8 = arith.constant 0 : index
    %17 = memref.load %arg2[%c0_8] : memref<1xf32, #tpu.memory_space<smem>>
    %18 = vector.broadcast %17 : f32 to vector<128x128xf32>
    %19 = arith.mulf %16, %18 : vector<128x128xf32>
    %20 = math.exp %19 : vector<128x128xf32>
    %c0_9 = arith.constant 0 : index
    %c0_10 = arith.constant 0 : index
    %21 = vector.load %arg5[%c0_9, %c0_10] : memref<128x128xf32, #tpu.memory_space<vmem>>, vector<128x128xf32>
    tpu.vector_store %arg5[%c0_9, %c0_10], %20 {strides = array<i32>} : memref<128x128xf32, #tpu.memory_space<vmem>>, vector<128x128xf32>,
    return
  }
  func.func @transform_0(%arg0: i32, %arg1: i32) -> i32 {
    %c0_i32 = arith.constant 0 : i32
    %c0_i32_0 = arith.constant 0 : i32
    return %c0_i32 : i32
  }
  func.func @transform_1(%arg0: i32, %arg1: i32) -> (i32, i32) {
    %c0_i32 = arith.constant 0 : i32
    %c0_i32_0 = arith.constant 0 : i32
    return %arg0, %c0_i32 : i32, i32
  }
  func.func @transform_2(%arg0: i32, %arg1: i32) -> (i32, i32) {
    %c0_i32 = arith.constant 0 : i32
    %c0_i32_0 = arith.constant 0 : i32
    return %arg1, %c0_i32 : i32, i32
  }
  func.func @transform_3(%arg0: i32, %arg1: i32) -> (i32, i32) {
    %c0_i32 = arith.constant 0 : i32
    return %arg0, %arg1 : i32, i32
  }
}

</mosaic_0001>

<bundles_post_ra>
// kernel: tpu_custom_call.1
= control target key start
LH: loop header
LB: loop body
LE: loop exit
PB: predicated region body
PF: predicated region fallthrough
CT: control target
= control target key end

     0   :  { %9 = vsyncpa [#allocation4], 0  ;;  %s992_s0 = inlined_call_operand.<no memory space> [shape: f32[1], index: 0, kind: input, shape index: {}]   ;;  %s993_s1 = inlined_call_operand.hbm [shape: f32[128,128], index: 1, kind: input, shape index: {}]   ;;  %s994_s2 = inlined_call_operand.hbm [shape: f32[128,128], index: 2, kind: input, shape index: {}]   ;;  %s995_s3 = inlined_call_operand.hbm [shape: f32[128,128], index: 3, kind: output, shape index: {}]  }
   0x1   :  { %10 = vsyncpa [#allocation7], 0 }
   0x2   :  { %11 = vsyncpa [#allocation5], 0  ;;  %s816_s12 = smov [#allocation3]   ;;  %s744_s16 = scalar_lea.hbm %s993_s1, 2048 }
   0x3   :  { %s19_s13 = sshll.u32 %s816_s12, 4  ;;  %p745_p0 = scmp.ne.s32.totalorder %s993_s1, %s744_s16  ;;  %s20_s13 = int_to_ptr.vmem [resolvable:$true] %s19_s13 }
   0x4   :  { %p748_p1 = scmp.lt.u32.totalorder %s744_s16, %s993_s1 }
   0x6   :  { %p750_p2 = pnand %p748_p1, %p745_p0 }
   0x8   :  { %753 = shalt.err (!%p750_p2)
}
   0x9   :  { %s754_s21 = scalar_lea.vmem %s20_s13, 2048  ;;  %p759_p4 = scmp.lt.s32.totalorder %s20_s13, %s20_s13 }
   0xa   :  { %p755_p3 = scmp.ne.s32.totalorder %s20_s13, %s754_s21  ;;  %p760_p5 = scmp.lt.s32.totalorder %s754_s21, %s754_s21 }
   0xc   :  { %p761_p6 = por %p760_p5, %p759_p4 }
   0xe   :  { %p762_p7 = pnand %p761_p6, %p755_p3 }
  0x10   :  { %765 = shalt.err (!%p762_p7)
}
  0x11   :  { %s817_s22 = smov 128   ;;  %s818_s23 = smov 8  }
  0x12   :  { %25 = dma.hbm_to_vmem [thread:$0]  %s993_s1, 2048, %s20_s13, [#allocation4], %s817_s22, %s817_s22, %s818_s23  }
  0x13   :  { %s819_s26 = smov [#allocation6]   ;;  %s766_s30 = scalar_lea.hbm %s994_s2, 2048 }
  0x14   :  { %s31_s27 = sshll.u32 %s819_s26, 4  ;;  %p767_p8 = scmp.ne.s32.totalorder %s994_s2, %s766_s30  ;;  %s32_s27 = int_to_ptr.vmem [resolvable:$true] %s31_s27 }
  0x15   :  { %p770_p9 = scmp.lt.u32.totalorder %s766_s30, %s994_s2 }
  0x17   :  { %p772_p10 = pnand %p770_p9, %p767_p8 }
  0x19   :  { %775 = shalt.err (!%p772_p10)
}
  0x1a   :  { %s776_s8 = scalar_lea.vmem %s32_s27, 2048  ;;  %p781_p12 = scmp.lt.s32.totalorder %s32_s27, %s32_s27 }
  0x1b   :  { %p777_p11 = scmp.ne.s32.totalorder %s32_s27, %s776_s8  ;;  %p782_p13 = scmp.lt.s32.totalorder %s776_s8, %s776_s8 }
  0x1d   :  { %p783_p0 = por %p782_p13, %p781_p12 }
  0x1f   :  { %p784_p1 = pnand %p783_p0, %p777_p11 }
  0x21   :  { %787 = shalt.err (!%p784_p1)
}
  0x22   :  { %37 = dma.hbm_to_vmem [thread:$0]  %s994_s2, 2048, %s32_s27, [#allocation7], %s817_s22, %s817_s22, %s818_s23  }
  0x23   :  { %810 = dma.done.wait [#allocation4], 2048  }
  0x24   :  { %811 = vsyncadd [#allocation4], 4294965248 }
  0x25   :  { %812 = dma.done.wait [#allocation7], 2048  }
  0x26   :  { %813 = vsyncadd [#allocation7], 4294965248  ;;  %v820_v0 = vmov 0.0|0.0   ;;  %vm821_vm0 = vmmov 0   ;;  %v822_v1 = vmov 0.0   ;;  %v60_v2 = vld [vmem:[#allocation6] sm:$0xff] }
  0x27   :  { %679 = vmatprep.subr.bf16.mxu1 %v820_v0  ;;  %644 = vmatprep.mubr.msk.f32.mxu1 %vm821_vm0, %v822_v1  ;;  %v61_v3 = vld [vmem:[#allocation6 + $0x8] sm:$0xff]  ;;  %v62_v4 = vld [vmem:[#allocation6 + $0x10] sm:$0xff]  ;;  %v269_v6 = vmul.f32 %v60_v2, %v60_v2  ;;  %v63_v8 = vld [vmem:[#allocation6 + $0x18] sm:$0xff] }
  0x28   :  { %v647_v5 = vpack.c.bf16 %v61_v3, %v60_v2  ;;  %v270_v7 = vmul.f32 %v61_v3, %v61_v3  ;;  %v651_v9 = vpack.c.bf16 %v63_v8, %v62_v4  ;;  %v271_v11 = vmul.f32 %v62_v4, %v62_v4  ;;  %v44_v13 = vld [vmem:[#allocation3] sm:$0xff]  ;;  %v65_v15 = vld [vmem:[#allocation6 + $0x28] sm:$0xff]  ;;  %v877_v16 = vld [vmem:[#allocation3 + $0x10] sm:$0xff] }
  0x29   :  { %v272_v12 = vmul.f32 %v63_v8, %v63_v8  ;;  %v64_v14 = vld [vmem:[#allocation6 + $0x20] sm:$0xff]  ;;  %588 = vmatprep.mubr.f32.mxu0 %v44_v13  ;;  %v221_v17 = vmul.f32 %v44_v13, %v44_v13  ;;  %v879_v20 = vld [vmem:[#allocation3 + $0x8] sm:$0xff]  ;;  %v223_v21 = vmul.f32 %v877_v16, %v877_v16  ;;  %v883_v22 = vld [vmem:[#allocation3 + $0x18] sm:$0xff]  ;;  %v274_v26 = vmul.f32 %v65_v15, %v65_v15 }
  0x2a   :  { %648 = vmatprep.subr.bf16.mxu0 %v647_v5  ;;  %v680_v10 = vpack.c.bf16 %v270_v7, %v269_v6  ;;  %v655_v19 = vpack.c.bf16 %v65_v15, %v64_v14  ;;  %v222_v23 = vmul.f32 %v879_v20, %v879_v20  ;;  %v224_v24 = vmul.f32 %v883_v22, %v883_v22  ;;  %v889_v27 = vld [vmem:[#allocation3 + $0x20] sm:$0xff]  ;;  %v66_v28 = vld [vmem:[#allocation6 + $0x30] sm:$0xff]  ;;  %v67_v29 = vld [vmem:[#allocation6 + $0x38] sm:$0xff] }
  0x2b   :  { %650 = vmatpush3.bf16.xpose.msra.mxu0 %v647_v5  ;;  %v683_v18 = vpack.c.bf16 %v272_v12, %v271_v11  ;;  %237 = vadd.xlane.f32.xlu0 %v221_v17  ;;  %v273_v25 = vmul.f32 %v64_v14, %v64_v14  ;;  %v892_v30 = vld [vmem:[#allocation3 + $0x28] sm:$0xff]  ;;  %v225_v31 = vmul.f32 %v889_v27, %v889_v27  ;;  %v898_v35 = vld [vmem:[#allocation3 + $0x30] sm:$0xff]  ;;  %v900_v36 = vld [vmem:[#allocation3 + $0x38] sm:$0xff] }
  0x2c   :  { %681 = vmatpush3.bf16.xpose.msra.mxu1 %v680_v10  ;;  %652 = vmatprep.subr.bf16.mxu0 %v651_v9  ;;  %v226_v32 = vmul.f32 %v892_v30, %v892_v30  ;;  %v659_v34 = vpack.c.bf16 %v67_v29, %v66_v28  ;;  %v227_v37 = vmul.f32 %v898_v35, %v898_v35  ;;  %v906_v41 = vld [vmem:[#allocation3 + $0x40] sm:$0xff]  ;;  %v69_v43 = vld [vmem:[#allocation6 + $0x48] sm:$0xff]  ;;  %v915_v49 = vld [vmem:[#allocation3 + $0x50] sm:$0xff] }
  0x2d   :  { %682 = vmatprep.subr.bf16.mxu1 %v820_v0  ;;  %241 = vadd.xlane.f32.xlu1 %v223_v21  ;;  %v686_v33 = vpack.c.bf16 %v274_v26, %v273_v25  ;;  %v228_v38 = vmul.f32 %v900_v36, %v900_v36  ;;  %v275_v39 = vmul.f32 %v66_v28, %v66_v28  ;;  %v68_v42 = vld [vmem:[#allocation6 + $0x40] sm:$0xff]  ;;  %v909_v44 = vld [vmem:[#allocation3 + $0x48] sm:$0xff]  ;;  %v917_v50 = vld [vmem:[#allocation3 + $0x58] sm:$0xff]  ;;  %v823_v21 = vmov 1.0  }
  0x2e   :  { %v276_v40 = vmul.f32 %v67_v29, %v67_v29  ;;  %v229_v45 = vmul.f32 %v906_v41, %v906_v41  ;;  %v230_v46 = vmul.f32 %v909_v44, %v909_v44  ;;  %v663_v48 = vpack.c.bf16 %v69_v43, %v68_v42  ;;  %v56_v55 = vld [vmem:[#allocation3 + $0x60] sm:$0xff]  ;;  %v70_v56 = vld [vmem:[#allocation6 + $0x50] sm:$0xff]  ;;  %v71_v57 = vld [vmem:[#allocation6 + $0x58] sm:$0xff] }
  0x2f   :  { %239 = vadd.xlane.f32.xlu0 %v222_v23  ;;  %v231_v51 = vmul.f32 %v915_v49, %v915_v49  ;;  %v232_v52 = vmul.f32 %v917_v50, %v917_v50  ;;  %v277_v53 = vmul.f32 %v68_v42, %v68_v42  ;;  %v278_v54 = vmul.f32 %v69_v43, %v69_v43  ;;  %v57_v58 = vld [vmem:[#allocation3 + $0x68] sm:$0xff]  ;;  %v58_v63 = vld [vmem:[#allocation3 + $0x70] sm:$0xff]  ;;  %v59_v1 = vld [vmem:[#allocation3 + $0x78] sm:$0xff] }
  0x30   :  { %v689_v47 = vpack.c.bf16 %v276_v40, %v275_v39  ;;  %v233_v59 = vmul.f32 %v56_v55, %v56_v55  ;;  %v234_v60 = vmul.f32 %v57_v58, %v57_v58  ;;  %v667_v62 = vpack.c.bf16 %v71_v57, %v70_v56  ;;  %v72_v6 = vld [vmem:[#allocation6 + $0x60] sm:$0xff]  ;;  %v73_v7 = vld [vmem:[#allocation6 + $0x68] sm:$0xff]  ;;  %v74_v12 = vld [vmem:[#allocation6 + $0x70] sm:$0xff] }
  0x31   :  { %243 = vadd.xlane.f32.xlu1 %v224_v24  ;;  %v692_v61 = vpack.c.bf16 %v278_v54, %v277_v53  ;;  %v235_v2 = vmul.f32 %v58_v63, %v58_v63  ;;  %v236_v3 = vmul.f32 %v59_v1, %v59_v1  ;;  %v279_v4 = vmul.f32 %v70_v56, %v70_v56  ;;  %v75_v13 = vld [vmem:[#allocation6 + $0x78] sm:$0xff] }
  0x32   :  { %v280_v5 = vmul.f32 %v71_v57, %v71_v57  ;;  %v281_v10 = vmul.f32 %v72_v6, %v72_v6  ;;  %v282_v11 = vmul.f32 %v73_v7, %v73_v7  ;;  %v675_v15 = vpack.c.bf16 %v75_v13, %v74_v12 }
  0x33   :  { %654 = vmatpush3.bf16.xpose.msra.mxu0 %v651_v9  ;;  %245 = vadd.xlane.f32.xlu0 %v225_v31  ;;  %v671_v9 = vpack.c.bf16 %v73_v7, %v72_v6  ;;  %v283_v17 = vmul.f32 %v74_v12, %v74_v12  ;;  %v355_v23 = vlaneseq }
  0x34   :  { %684 = vmatpush3.bf16.xpose.msra.mxu1 %v683_v18  ;;  %656 = vmatprep.subr.bf16.mxu0 %v655_v19  ;;  %v695_v8 = vpack.c.bf16 %v280_v5, %v279_v4  ;;  %v698_v14 = vpack.c.bf16 %v282_v11, %v281_v10  ;;  %v284_v18 = vmul.f32 %v75_v13, %v75_v13 }
  0x35   :  { %685 = vmatprep.subr.bf16.mxu1 %v820_v0  ;;  %247 = vadd.xlane.f32.xlu1 %v226_v32  ;;  %v356_v25 = vshrl.u32 %v355_v23, 7 }
  0x37   :  { %249 = vadd.xlane.f32.xlu0 %v227_v37 }
  0x39   :  { %251 = vadd.xlane.f32.xlu1 %v228_v38 }
  0x3b   :  { %658 = vmatpush3.bf16.xpose.msra.mxu0 %v655_v19  ;;  %253 = vadd.xlane.f32.xlu0 %v229_v45  ;;  %v701_v19 = vpack.c.bf16 %v284_v18, %v283_v17  ;;  %v946_v45 = vstv %s992_s0  ;;  %s824_s0 = smov [#allocation8]  }
  0x3c   :  { %687 = vmatpush3.bf16.xpose.msra.mxu1 %v686_v33  ;;  %660 = vmatprep.subr.bf16.mxu0 %v659_v34  ;;  %s494_s11 = sshll.u32 %s824_s0, 4  ;;  %s495_s11 = int_to_ptr.vmem [resolvable:$true] %s494_s11 }
  0x3d   :  { %688 = vmatprep.subr.bf16.mxu1 %v820_v0  ;;  %255 = vadd.xlane.f32.xlu1 %v230_v46  ;;  %s788_s12 = scalar_lea.vmem %s495_s11, 2048  ;;  %p793_p3 = scmp.lt.s32.totalorder %s495_s11, %s495_s11 }
  0x3e   :  { %p789_p2 = scmp.ne.s32.totalorder %s495_s11, %s788_s12  ;;  %p794_p4 = scmp.lt.s32.totalorder %s788_s12, %s788_s12 }
  0x3f   :  { %257 = vadd.xlane.f32.xlu0 %v231_v51 }
  0x40   :  { %p795_p5 = por %p794_p4, %p793_p3 }
  0x41   :  { %259 = vadd.xlane.f32.xlu1 %v232_v52 }
  0x42   :  { %p796_p6 = pnand %p795_p5, %p789_p2 }
  0x43   :  { %662 = vmatpush3.bf16.xpose.msra.mxu0 %v659_v34  ;;  %261 = vadd.xlane.f32.xlu0 %v233_v59 }
  0x44   :  { %690 = vmatpush3.bf16.xpose.msra.mxu1 %v689_v47  ;;  %664 = vmatprep.subr.bf16.mxu0 %v663_v48 }
  0x45   :  { %691 = vmatprep.subr.bf16.mxu1 %v820_v0  ;;  %263 = vadd.xlane.f32.xlu1 %v234_v60 }
  0x47   :  { %265 = vadd.xlane.f32.xlu0 %v235_v2 }
  0x49   :  { %267 = vadd.xlane.f32.xlu1 %v236_v3 }
  0x4b   :  { %666 = vmatpush3.bf16.xpose.msra.mxu0 %v663_v48 }
  0x4c   :  { %693 = vmatpush3.bf16.xpose.msra.mxu1 %v692_v61  ;;  %668 = vmatprep.subr.bf16.mxu0 %v667_v62 }
  0x4d   :  { %694 = vmatprep.subr.bf16.mxu1 %v820_v0 }
  0x53   :  { %670 = vmatpush3.bf16.xpose.msra.mxu0 %v667_v62 }
  0x54   :  { %696 = vmatpush3.bf16.xpose.msra.mxu1 %v695_v8  ;;  %672 = vmatprep.subr.bf16.mxu0 %v671_v9 }
  0x55   :  { %697 = vmatprep.subr.bf16.mxu1 %v820_v0 }
  0x5b   :  { %674 = vmatpush3.bf16.xpose.msra.mxu0 %v671_v9 }
  0x5c   :  { %699 = vmatpush3.bf16.xpose.msra.mxu1 %v698_v14  ;;  %676 = vmatprep.subr.bf16.mxu0 %v675_v15 }
  0x5d   :  { %700 = vmatprep.subr.bf16.mxu1 %v820_v0 }
  0x63   :  { %678 = vmatpush3.bf16.xpose.msra.mxu0 %v675_v15 }
  0x64   :  { %702 = vmatpush3.bf16.xpose.msra.mxu1 %v701_v19 }
  0x6a   :  { %589 = vmatmul.mubr.f32.vlgmr.msra.gmra.mrb[0].mxu0 %v879_v20 }
  0x6b   :  { %645 = vmatmul.mubr.f32.vlgmr.msra.gmra.mrb[0].mxu1 %v823_v21  ;;  %591 = vmatprep.mubr.f32.mxu0 %v877_v16 }
  0x6e   :  { %592 = vmatmul.mubr.f32.gmra.mrb[2].mxu0 %v883_v22 }
  0x6f   :  { %594 = vmatprep.mubr.f32.mxu0 %v889_v27  ;;  %v357_v27 = vsub.s32 0, %v356_v25 }
  0x72   :  { %595 = vmatmul.mubr.f32.gmra.mrb[4].mxu0 %v892_v30 }
  0x73   :  { %597 = vmatprep.mubr.f32.mxu0 %v898_v35 }
  0x76   :  { %598 = vmatmul.mubr.f32.gmra.mrb[6].mxu0 %v900_v36 }
  0x77   :  { %600 = vmatprep.mubr.f32.mxu0 %v906_v41 }
  0x7a   :  { %601 = vmatmul.mubr.f32.gmra.mrb[8].mxu0 %v909_v44 }
  0x7b   :  { %603 = vmatprep.mubr.f32.mxu0 %v915_v49 }
  0x7e   :  { %604 = vmatmul.mubr.f32.gmra.mrb[10].mxu0 %v917_v50 }
  0x7f   :  { %606 = vmatprep.mubr.f32.mxu0 %v56_v55 }
  0x82   :  { %607 = vmatmul.mubr.f32.gmra.mrb[12].mxu0 %v57_v58 }
  0x83   :  { %609 = vmatprep.mubr.f32.mxu0 %v58_v63 }
  0x86   :  { %610 = vmatmul.mubr.f32.gmra.mrb[14].mxu0 %v59_v1 }
  0xb8   :  { %v238_v16 = vpop.xlane.xlu0 %237 }
  0xba   :  { %v242_v0 = vpop.xlane.xlu1 %241 }
  0xbc   :  { %v240_v22 = vpop.xlane.xlu0 %239 }
  0xbe   :  { %v244_v20 = vpop.xlane.xlu1 %243 }
  0xc0   :  { %v246_v24 = vpop.xlane.xlu0 %245 }
  0xc2   :  { %v248_v26 = vpop.xlane.xlu1 %247 }
  0xc4   :  { %v250_v28 = vpop.xlane.xlu0 %249 }
  0xc6   :  { %v252_v30 = vpop.xlane.xlu1 %251 }
  0xc8   :  { %v254_v48 = vpop.xlane.xlu0 %253 }
  0xca   :  { %v256_v44 = vpop.xlane.xlu1 %255 }
  0xcc   :  { %v258_v13 = vpop.xlane.xlu0 %257 }
  0xce   :  { %v260_v8 = vpop.xlane.xlu1 %259 }
 0x13d   :  { %v590_v29 = vpop.f32.mrb[0].mxu0 }
 0x13e   :  { %v142_v31 = vpop.f32.mrb[1].mxu0  ;;  %v351_v32 = vpop.f32.mrb[0].mxu1  ;;  %v376_v35 = vmul.f32 2.0, %v590_v29 }
 0x13f   :  { %v938_v33 = vrot.slane %v351_v32, %v357_v27  ;;  %v646_v34 = vpop.f32.mrb[1].mxu1  ;;  %v375_v53 = vmul.f32 2.0, %v142_v31  ;;  %v264_v31 = vpop.xlane.xlu1 %263 }
 0x141   :  { %v360_v36 = vadd.f32 %v938_v33, %v240_v22  ;;  %v362_v37 = vadd.f32 %v938_v33, %v244_v20  ;;  %v593_v38 = vpop.f32.mrb[2].mxu0  ;;  %v361_v42 = vadd.f32 %v938_v33, %v242_v0  ;;  %v364_v47 = vadd.f32 %v938_v33, %v248_v26 }
 0x142   :  { %v378_v39 = vmul.f32 2.0, %v593_v38  ;;  %v152_v40 = vpop.f32.mrb[3].mxu0  ;;  %v363_v52 = vadd.f32 %v938_v33, %v246_v24  ;;  %v359_v57 = vadd.f32 %v938_v33, %v238_v16  ;;  %v366_v61 = vadd.f32 %v938_v33, %v252_v30 }
 0x143   :  { %v392_v41 = vsub.f32 %v360_v36, %v376_v35  ;;  %v377_v43 = vmul.f32 2.0, %v152_v40  ;;  %v365_v1 = vadd.f32 %v938_v33, %v250_v28  ;;  %v368_v7 = vadd.f32 %v938_v33, %v256_v44 }
 0x144   :  { %v394_v46 = vsub.f32 %v362_v37, %v378_v39  ;;  %v391_v2 = vsub.f32 %v359_v57, %v375_v53  ;;  %v367_v23 = vadd.f32 %v938_v33, %v254_v48  ;;  %v370_v36 = vadd.f32 %v938_v33, %v260_v8  ;;  %v262_v37 = vpop.xlane.xlu0 %261 }
 0x145   :  { %v408_v49 = vmax.f32 %v392_v41, 0.0  ;;  %v393_v50 = vsub.f32 %v361_v42, %v377_v43  ;;  %v596_v51 = vpop.f32.mrb[4].mxu0  ;;  %v369_v41 = vadd.f32 %v938_v33, %v258_v13  ;;  %v371_v57 = vadd.f32 %v938_v33, %v262_v37 }
 0x146   :  { %v410_v54 = vmax.f32 %v394_v46, 0.0  ;;  %v380_v55 = vmul.f32 2.0, %v596_v51  ;;  %v162_v56 = vpop.f32.mrb[5].mxu0  ;;  %v407_v14 = vmax.f32 %v391_v2, 0.0 }
 0x147   :  { %v426_v58 = vmul.f32 %v946_v45, %v408_v49  ;;  %v409_v59 = vmax.f32 %v393_v50, 0.0  ;;  %v379_v60 = vmul.f32 2.0, %v162_v56 }
 0x148   :  { %v428_v62 = vmul.f32 %v946_v45, %v410_v54  ;;  %v396_v63 = vsub.f32 %v364_v47, %v380_v55  ;;  %v425_v0 = vmul.f32 %v946_v45, %v407_v14 }
 0x149   :  { %v443_v3 = vmul.f32 1.442695, %v426_v58  ;;  %v427_v4 = vmul.f32 %v946_v45, %v409_v59  ;;  %v395_v5 = vsub.f32 %v363_v52, %v379_v60  ;;  %v599_v6 = vpop.f32.mrb[6].mxu0  ;;  %v372_v52 = vadd.f32 %v938_v33, %v264_v31  ;;  %v268_v58 = vpop.xlane.xlu1 %267 }
 0x14a   :  { %v447_v9 = vmul.f32 1.442695, %v428_v62  ;;  %v412_v10 = vmax.f32 %v396_v63, 0.0  ;;  %v382_v11 = vmul.f32 2.0, %v599_v6  ;;  %v172_v12 = vpop.f32.mrb[7].mxu0  ;;  %v374_v8 = vadd.f32 %v938_v33, %v268_v58 }
 0x14b   :  { %712 = vpow2.f32 %v443_v3  ;;  %v445_v15 = vmul.f32 1.442695, %v427_v4  ;;  %v411_v17 = vmax.f32 %v395_v5, 0.0  ;;  %v381_v18 = vmul.f32 2.0, %v172_v12 }
 0x14c   :  { %714 = vpow2.f32 %v447_v9  ;;  %v430_v19 = vmul.f32 %v946_v45, %v412_v10  ;;  %v398_v21 = vsub.f32 %v366_v61, %v382_v11  ;;  %v441_v32 = vmul.f32 1.442695, %v425_v0 }
 0x14d   :  { %716 = vpow2.f32 %v445_v15  ;;  %v429_v16 = vmul.f32 %v946_v45, %v411_v17  ;;  %v397_v20 = vsub.f32 %v365_v1, %v381_v18  ;;  %v602_v22 = vpop.f32.mrb[8].mxu0  ;;  %v266_v1 = vpop.xlane.xlu0 %265 }
 0x14e   :  { %v451_v24 = vmul.f32 1.442695, %v430_v19  ;;  %v414_v25 = vmax.f32 %v398_v21, 0.0  ;;  %v384_v26 = vmul.f32 2.0, %v602_v22  ;;  %v182_v27 = vpop.f32.mrb[9].mxu0  ;;  %v373_v12 = vadd.f32 %v938_v33, %v266_v1 }
 0x14f   :  { %v449_v28 = vmul.f32 1.442695, %v429_v16  ;;  %v413_v29 = vmax.f32 %v397_v20, 0.0  ;;  %v383_v30 = vmul.f32 2.0, %v182_v27 }
 0x150   :  { %718 = vpow2.f32 %v451_v24  ;;  %v432_v34 = vmul.f32 %v946_v45, %v414_v25  ;;  %v400_v35 = vsub.f32 %v368_v7, %v384_v26 }
 0x151   :  { %720 = vpow2.f32 %v449_v28  ;;  %v431_v38 = vmul.f32 %v946_v45, %v413_v29  ;;  %v399_v39 = vsub.f32 %v367_v23, %v383_v30  ;;  %v605_v40 = vpop.f32.mrb[10].mxu0 }
 0x152   :  { %v455_v42 = vmul.f32 1.442695, %v432_v34  ;;  %v416_v43 = vmax.f32 %v400_v35, 0.0  ;;  %v386_v44 = vmul.f32 2.0, %v605_v40  ;;  %v192_v46 = vpop.f32.mrb[11].mxu0  ;;  %722 = vpow2.f32 %v441_v32 }
 0x153   :  { %v453_v47 = vmul.f32 1.442695, %v431_v38  ;;  %v415_v48 = vmax.f32 %v399_v39, 0.0  ;;  %v385_v49 = vmul.f32 2.0, %v192_v46 }
 0x154   :  { %724 = vpow2.f32 %v455_v42  ;;  %v434_v50 = vmul.f32 %v946_v45, %v416_v43  ;;  %v402_v51 = vsub.f32 %v370_v36, %v386_v44 }
 0x155   :  { %v713_v53 = vpop.eup %712  ;;  %726 = vpow2.f32 %v453_v47  ;;  %v433_v54 = vmul.f32 %v946_v45, %v415_v48  ;;  %v401_v55 = vsub.f32 %v369_v41, %v385_v49  ;;  %v608_v56 = vpop.f32.mrb[12].mxu0 }
 0x156   :  { %v715_v59 = vpop.eup %714  ;;  %474 = vst [vmem:[#allocation8 + $0x8] sm:$0xff] %v713_v53  ;;  %v459_v60 = vmul.f32 1.442695, %v434_v50  ;;  %v418_v61 = vmax.f32 %v402_v51, 0.0  ;;  %v388_v62 = vmul.f32 2.0, %v608_v56  ;;  %v202_v63 = vpop.f32.mrb[13].mxu0 }
 0x157   :  { %v717_v2 = vpop.eup %716  ;;  %476 = vst [vmem:[#allocation8 + $0x18] sm:$0xff] %v715_v59  ;;  %v457_v3 = vmul.f32 1.442695, %v433_v54  ;;  %v417_v4 = vmax.f32 %v401_v55, 0.0  ;;  %v387_v5 = vmul.f32 2.0, %v202_v63 }
 0x158   :  { %475 = vst [vmem:[#allocation8 + $0x10] sm:$0xff] %v717_v2  ;;  %728 = vpow2.f32 %v459_v60  ;;  %v436_v6 = vmul.f32 %v946_v45, %v418_v61  ;;  %v404_v7 = vsub.f32 %v372_v52, %v388_v62 }
 0x159   :  { %730 = vpow2.f32 %v457_v3  ;;  %v435_v9 = vmul.f32 %v946_v45, %v417_v4  ;;  %v403_v10 = vsub.f32 %v371_v57, %v387_v5  ;;  %v611_v11 = vpop.f32.mrb[14].mxu0 }
 0x15a   :  { %v719_v13 = vpop.eup %718  ;;  %v463_v14 = vmul.f32 1.442695, %v436_v6  ;;  %v420_v15 = vmax.f32 %v404_v7, 0.0  ;;  %v390_v17 = vmul.f32 2.0, %v611_v11  ;;  %v212_v18 = vpop.f32.mrb[15].mxu0 }
 0x15b   :  { %v721_v19 = vpop.eup %720  ;;  %478 = vst [vmem:[#allocation8 + $0x28] sm:$0xff] %v719_v13  ;;  %v461_v21 = vmul.f32 1.442695, %v435_v9  ;;  %v419_v0 = vmax.f32 %v403_v10, 0.0  ;;  %v389_v16 = vmul.f32 2.0, %v212_v18 }
 0x15c   :  { %v723_v20 = vpop.eup %722  ;;  %477 = vst [vmem:[#allocation8 + $0x20] sm:$0xff] %v721_v19  ;;  %732 = vpow2.f32 %v463_v14  ;;  %v438_v22 = vmul.f32 %v946_v45, %v420_v15  ;;  %v406_v23 = vsub.f32 %v374_v8, %v390_v17 }
 0x15d   :  { %734 = vpow2.f32 %v461_v21  ;;  %v437_v24 = vmul.f32 %v946_v45, %v419_v0  ;;  %v405_v33 = vsub.f32 %v373_v12, %v389_v16  ;;  %473 = vst [vmem:[#allocation8] sm:$0xff] %v723_v20 }
 0x15e   :  { %v725_v25 = vpop.eup %724  ;;  %v467_v26 = vmul.f32 1.442695, %v438_v22  ;;  %v422_v27 = vmax.f32 %v406_v23, 0.0 }
 0x15f   :  { %v727_v28 = vpop.eup %726  ;;  %480 = vst [vmem:[#allocation8 + $0x38] sm:$0xff] %v725_v25  ;;  %v465_v29 = vmul.f32 1.442695, %v437_v24  ;;  %v421_v30 = vmax.f32 %v405_v33, 0.0 }
 0x160   :  { %479 = vst [vmem:[#allocation8 + $0x30] sm:$0xff] %v727_v28  ;;  %736 = vpow2.f32 %v467_v26  ;;  %v440_v31 = vmul.f32 %v946_v45, %v422_v27 }
 0x161   :  { %738 = vpow2.f32 %v465_v29  ;;  %v439_v32 = vmul.f32 %v946_v45, %v421_v30 }
 0x162   :  { %v729_v34 = vpop.eup %728  ;;  %v471_v35 = vmul.f32 1.442695, %v440_v31 }
 0x163   :  { %v731_v36 = vpop.eup %730  ;;  %482 = vst [vmem:[#allocation8 + $0x48] sm:$0xff] %v729_v34  ;;  %v469_v37 = vmul.f32 1.442695, %v439_v32 }
 0x164   :  { %481 = vst [vmem:[#allocation8 + $0x40] sm:$0xff] %v731_v36  ;;  %740 = vpow2.f32 %v471_v35 }
 0x165   :  { %742 = vpow2.f32 %v469_v37 }
 0x166   :  { %v733_v38 = vpop.eup %732 }
 0x167   :  { %v735_v39 = vpop.eup %734  ;;  %484 = vst [vmem:[#allocation8 + $0x58] sm:$0xff] %v733_v38 }
 0x168   :  { %483 = vst [vmem:[#allocation8 + $0x50] sm:$0xff] %v735_v39 }
 0x16a   :  { %v737_v40 = vpop.eup %736 }
 0x16b   :  { %v739_v41 = vpop.eup %738  ;;  %486 = vst [vmem:[#allocation8 + $0x68] sm:$0xff] %v737_v40 }
 0x16c   :  { %485 = vst [vmem:[#allocation8 + $0x60] sm:$0xff] %v739_v41 }
 0x16e   :  { %v741_v42 = vpop.eup %740 }
 0x16f   :  { %v743_v45 = vpop.eup %742  ;;  %488 = vst [vmem:[#allocation8 + $0x78] sm:$0xff] %v741_v42 }
 0x170   :  { %487 = vst [vmem:[#allocation8 + $0x70] sm:$0xff] %v743_v45 }
 0x171   :  { %799 = shalt.err (!%p796_p6)
}
 0x172   :  { %s800_s15 = scalar_lea.hbm %s995_s3, 2048 }
 0x173   :  { %p801_p7 = scmp.ne.s32.totalorder %s995_s3, %s800_s15  ;;  %p804_p8 = scmp.lt.u32.totalorder %s800_s15, %s995_s3 }
 0x175   :  { %p806_p9 = pnand %p804_p8, %p801_p7 }
 0x177   :  { %809 = shalt.err (!%p806_p9)
}
 0x178   :  { %500 = dma.vmem_to_hbm [thread:$0]  %s495_s11, 2048, %s995_s3, [#allocation5], %s817_s22, %s817_s22, %s818_s23  }
 0x179   :  { %814 = dma.done.wait [#allocation5], 2048  }
 0x17a   :  { %815 = vsyncadd [#allocation5], 4294965248 }
 0x17b   :  { %504 = vsyncpa [#allocation4], 1 }
 0x17c   :  { %505 = vsyncpa [#allocation7], 1 }
 0x17d   :  { %506 = vsyncpa [#allocation5], 1 }

</bundles_post_ra>
